<compile_context>
chip_gen: v7x
topology: tpu7x:2x2x1
jax: 0.10.0
libtpu: 0.0.40
codegen_flags: <defaults>
</compile_context>

<pallas_src>
import jax
import jax.numpy as jnp
from jax.experimental import pallas as pl
from jax.experimental.pallas import tpu as pltpu


def linear_kernel(x_ref, w_ref, b_ref, o_ref):
    # x_ref : (TB, K) VMEM -- streaming batch tile
    # w_ref : (K, N)  VMEM -- resident weight, MXU-stationary (K, N) layout
    # b_ref : (1, N)  VMEM -- resident bias
    # o_ref : (TB, N) VMEM
    acc = jnp.dot(x_ref[...], w_ref[...], preferred_element_type=jnp.float32)
    o_ref[...] = (acc + b_ref[...]).astype(o_ref.dtype)


def _round_up(x, m):
    return ((x + m - 1) // m) * m


def _vmem_capacity_bytes():
    try:
        return int(pltpu.get_tpu_info().vmem_capacity_bytes)
    except Exception:
        return 64 * 1024 * 1024  # conservative fallback: v7x physical VMEM per TC


def _pick_batch_tile(B, K, N, itemsize, vmem_budget_bytes, max_tb=1024):
    """Largest batch tile (multiple of 8, <= max_tb) whose double-buffered x/y tiles
    plus the (also double-buffered) resident weight/bias fit the VMEM budget."""
    tb = min(max_tb, _round_up(B, 8))
    tb = _round_up(tb, 8)
    resident = 2 * (K * N + N) * itemsize  # weight + bias, each double-buffered
    while tb > 8:
        need = 2 * (tb * K + tb * N) * itemsize + resident
        if need <= vmem_budget_bytes:
            break
        tb -= 8
    return max(tb, 8)


def net_forward(x, weight, bias, *, max_batch_tile=1024):
    """Forward pass of Net: y = x @ weight.T + bias.

    x:      (B, num_inputs)            float32
    weight: (num_outputs, num_inputs)  float32  (PyTorch layout)
    bias:   (num_outputs,)             float32
    returns (B, num_outputs)           float32
    """
    B, K = x.shape
    N = weight.shape[0]
    itemsize = x.dtype.itemsize

    capacity = _vmem_capacity_bytes()
    budget = capacity // 3  # ~21 MiB on v7x, ~42 MiB on v5e/v6e
    TB = _pick_batch_tile(B, K, N, itemsize, budget, max_tb=max_batch_tile)
    # Ensure >= 2 grid steps for non-tiny batches so v7x's 2 TensorCores both get work.
    if B >= 16:
        TB = min(TB, _round_up(pl.cdiv(B, 2), 8))
    grid = (pl.cdiv(B, TB),)

    # One-off layout fixes in the wrapper: MXU-stationary weight, 2-D bias row.
    w_t = jnp.transpose(weight)  # (K, N)
    b2 = bias.reshape(1, N)

    vmem_need = 2 * (TB * K + TB * N) * itemsize + 2 * (K * N + N) * itemsize
    vmem_limit = int(min(capacity * 3 // 4,
                         max(32 * 1024 * 1024, vmem_need + (4 << 20))))

    cost = pl.CostEstimate(
        flops=2 * B * K * N,
        transcendentals=0,
        bytes_accessed=(B * K + K * N + N + B * N) * itemsize,
    )

    return pl.pallas_call(
        linear_kernel,
        out_shape=jax.ShapeDtypeStruct((B, N), x.dtype),
        grid=grid,
        in_specs=[
            pl.BlockSpec((TB, K), lambda i: (i, 0)),  # batch tile streams through VMEM
            pl.BlockSpec((K, N), lambda i: (0, 0)),   # weight resident every step
            pl.BlockSpec((1, N), lambda i: (0, 0)),   # bias resident every step
        ],
        out_specs=pl.BlockSpec((TB, N), lambda i: (i, 0)),
        compiler_params=pltpu.CompilerParams(
            dimension_semantics=("parallel",),        # shard batch tiles across cores
            vmem_limit_bytes=vmem_limit,
        ),
        cost_estimate=cost,
    )(x, w_t, b2)


if __name__ == "__main__":
    # Small shapes consistent with the module: features -> outputs regression.
    batch = 8
    num_inputs = 32
    num_outputs = 4

    key = jax.random.PRNGKey(0)
    kx, kw, kb, kx2 = jax.random.split(key, 4)

    # Deterministic parameter init (uniform, roughly like PyTorch's default scale).
    bound = 1.0 / (num_inputs ** 0.5)
    x = jax.random.normal(kx, (batch, num_inputs), dtype=jnp.float32)
    weight = jax.random.uniform(
        kw, (num_outputs, num_inputs), minval=-bound, maxval=bound, dtype=jnp.float32
    )
    bias = jax.random.uniform(
        kb, (num_outputs,), minval=-bound, maxval=bound, dtype=jnp.float32
    )

    y = jax.block_until_ready(net_forward(x, weight, bias))
    y_ref = x @ weight.T + bias
    assert y.shape == (batch, num_outputs)
    assert jnp.allclose(y, y_ref, atol=1e-5, rtol=1e-5)

    # Exercise the ragged-grid path (B not a multiple of the batch tile): no pad/slice copies.
    x2 = jax.random.normal(kx2, (50, num_inputs), dtype=jnp.float32)
    y2 = jax.block_until_ready(net_forward(x2, weight, bias, max_batch_tile=16))
    y2_ref = x2 @ weight.T + bias
    assert y2.shape == (50, num_outputs)
    assert jnp.allclose(y2, y2_ref, atol=1e-5, rtol=1e-5)

    print("KERNEL_OK")
</pallas_src>

<mosaic_0001>
module attributes {stable_mosaic.version = 11 : i64} {
  func.func @linear_kernel(%arg0: i32, %arg1: memref<8x32xf32, #tpu.memory_space<vmem>>, %arg2: memref<32x4xf32, #tpu.memory_space<vmem>>, %arg3: memref<1x4xf32, #tpu.memory_space<vmem>>, %arg4: memref<8x4xf32, #tpu.memory_space<vmem>>) attributes {dimension_semantics = [#tpu.dimension_semantics<parallel>], iteration_bounds = array<i64: 1>, scalar_prefetch = 0 : i64, scratch_operands = 0 : i64, tpu.core_type = #tpu.core_type<tc>, window_params = [{transform_indices = @transform_0, window_bounds = array<i64: 8, 32>}, {pipeline_mode = #tpu.pipeline_mode<synchronous>, transform_indices = @transform_1, window_bounds = array<i64: 32, 4>}, {pipeline_mode = #tpu.pipeline_mode<synchronous>, transform_indices = @transform_2, window_bounds = array<i64: 1, 4>}, {transform_indices = @transform_3, window_bounds = array<i64: 8, 4>}]} {
    %c0 = arith.constant 0 : index
    %c0_0 = arith.constant 0 : index
    %0 = vector.load %arg1[%c0, %c0_0] : memref<8x32xf32, #tpu.memory_space<vmem>>, vector<8x32xf32>
    %c0_1 = arith.constant 0 : index
    %c0_2 = arith.constant 0 : index
    %1 = vector.load %arg2[%c0_1, %c0_2] : memref<32x4xf32, #tpu.memory_space<vmem>>, vector<32x4xf32>
    %cst = arith.constant dense<0.000000e+00> : vector<8x4xf32>
    %2 = tpu.matmul %0, %1, %cst {dimension_numbers = #tpu.dot_dimension_numbers<[1], [0], [0], [1], [0, 0, 1, 1], [], []>} : vector<8x32xf32>, vector<32x4xf32>, vector<8x4xf32> -> vector<8x4xf32>
    %c0_3 = arith.constant 0 : index
    %c0_4 = arith.constant 0 : index
    %3 = vector.load %arg3[%c0_3, %c0_4] : memref<1x4xf32, #tpu.memory_space<vmem>>, vector<1x4xf32>
    %4 = vector.broadcast %3 : vector<1x4xf32> to vector<8x4xf32>
    %5 = arith.addf %2, %4 : vector<8x4xf32>
    %c0_5 = arith.constant 0 : index
    %c0_6 = arith.constant 0 : index
    %6 = vector.load %arg4[%c0_5, %c0_6] : memref<8x4xf32, #tpu.memory_space<vmem>>, vector<8x4xf32>
    tpu.vector_store %arg4[%c0_5, %c0_6], %5 {strides = array<i32>} : memref<8x4xf32, #tpu.memory_space<vmem>>, vector<8x4xf32>,
    return
  }
  func.func @transform_0(%arg0: i32) -> (i32, i32) {
    %c0_i32 = arith.constant 0 : i32
    %c0_i32_0 = arith.constant 0 : i32
    return %arg0, %c0_i32 : i32, i32
  }
  func.func @transform_1(%arg0: i32) -> (i32, i32) {
    %c0_i32 = arith.constant 0 : i32
    %c0_i32_0 = arith.constant 0 : i32
    %c0_i32_1 = arith.constant 0 : i32
    return %c0_i32, %c0_i32_0 : i32, i32
  }
  func.func @transform_2(%arg0: i32) -> (i32, i32) {
    %c0_i32 = arith.constant 0 : i32
    %c0_i32_0 = arith.constant 0 : i32
    %c0_i32_1 = arith.constant 0 : i32
    return %c0_i32, %c0_i32_0 : i32, i32
  }
  func.func @transform_3(%arg0: i32) -> (i32, i32) {
    %c0_i32 = arith.constant 0 : i32
    %c0_i32_0 = arith.constant 0 : i32
    return %arg0, %c0_i32 : i32, i32
  }
}

</mosaic_0001>

<bundles_post_ra>
// kernel: tpu_custom_call.1
= control target key start
LH: loop header
LB: loop body
LE: loop exit
PB: predicated region body
PF: predicated region fallthrough
CT: control target
= control target key end

     0   :  { %v133_v0 = vmov 0.0|0.0   ;;  %vm134_vm0 = vmmov 0   ;;  %v135_v4 = vmov 0.0   ;;  %vm26_vm1 = vcmask 261120   ;;  %s177_s1 = inlined_call_operand.vmem [shape: f32[32,4], index: 1, kind: input, shape index: {}]   ;;  %s178_s0 = inlined_call_operand.vmem [shape: f32[8,32], index: 0, kind: input, shape index: {}]   ;;  %s179_s2 = inlined_call_operand.vmem [shape: f32[1,4], index: 2, kind: input, shape index: {}]   ;;  %s180_s3 = inlined_call_operand.vmem [shape: f32[8,4], index: 3, kind: output, shape index: {}]  }
   0x1   :  { %124 = vmatprep.subr.bf16.mxu0 %v133_v0  ;;  %v15_v1 = vld [vmem:[%s177_s1] sm:$0xff]  ;;  %v16_v2 = vld [vmem:[%s177_s1 + $0x8] sm:$0xff]  ;;  %v17_v3 = vld [vmem:[%s177_s1 + $0x10] sm:$0xff]  ;;  %121 = vmatprep.mubr.msk.f32.mxu0 %vm134_vm0, %v135_v4  ;;  %vm100_vm2 = vcmask 31744  }
   0x2   :  { %v125_v5 = vpack.c.bf16 %v16_v2, %v15_v1  ;;  %v18_v6 = vld [vmem:[%s177_s1 + $0x18] sm:$0xff]  ;;  %v14_v8 = vld [vmem:[%s178_s0] sm:$0xff] }
   0x3   :  { %v128_v7 = vpack.c.bf16 %v18_v6, %v17_v3  ;;  %v106_v9 = vld [vmem:[%s179_s2] ss:$0 sm:$0xff] }
   0x4   :  { %126 = vmatpush3.bf16.msra.mxu0 %v125_v5 }
   0x5   :  { %127 = vmatprep.subr.bf16.mxu0 %v133_v0 }
   0x8   :  { %129 = vmatpush3.bf16.msra.mxu0 %v128_v7 }
   0xb   :  { %122 = vmatmul.mubr.msk.f32.vlgmr.msra.gmra.mrb[0].mxu0 %vm26_vm1, %v14_v8 }
  0xde   :  { %v96_v10 = vpop.f32.mrb[0].mxu0 }
  0xdf   :  { %v97_v11 = vadd.f32 %v106_v9, %v96_v10  ;;  %v123_v12 = vpop.f32.mrb[1].mxu0 }
  0xe1   :  { %101 = vst.msk [vmem:[%s180_s3] sm:$0xff] %vm100_vm2, %v97_v11 }

</bundles_post_ra>
